<compile_context>
chip_gen: v5e
topology: v5e:2x2
jax: 0.10.0
libtpu: 0.0.40
codegen_flags: <defaults>
</compile_context>

<pallas_src>
from typing import NamedTuple

import jax
import jax.numpy as jnp
from jax.experimental import pallas as pl
from jax.experimental.pallas import tpu as pltpu


def _round_up(x, m):
    return ((x + m - 1) // m) * m


def _divisor_tile(total, target, step=128):
    """Largest multiple of `step` that divides `total` and is <= target.

    `total` must be a multiple of `step` (so `step` itself always works)."""
    target = max(step, min(target, total))
    best = step
    d = step
    while d <= target:
        if total % d == 0:
            best = d
        d += step
    return best


class LensParams(NamedTuple):
    W: jax.Array        # (K_pad, N_pad), compute dtype (bf16 by default)
    b: jax.Array        # (1, N_pad), float32
    dim_in: int
    dim_out: int


def prepare_lens_params(W, b=None, *, compute_dtype=jnp.bfloat16):
    """Pad W/b to lane-aligned shapes and cast once (hoisted out of the per-call path)."""
    D_in, D_out = W.shape
    K_pad = _round_up(D_in, 128)
    N_pad = _round_up(D_out, 256)      # 256-aligned N -> MXU-friendly tn divisors
    Wp = W
    if (K_pad, N_pad) != (D_in, D_out):
        Wp = jnp.pad(W, ((0, K_pad - D_in), (0, N_pad - D_out)))
    Wp = Wp.astype(compute_dtype)
    if b is None:
        bp = jnp.zeros((N_pad,), jnp.float32)
    else:
        bp = b.astype(jnp.float32)
        if N_pad != D_out:
            bp = jnp.pad(bp, (0, N_pad - D_out))
    return LensParams(W=Wp, b=bp.reshape(1, N_pad), dim_in=D_in, dim_out=D_out)


# ----------------------------- kernels ---------------------------------------


def _lens_kernel_fused(h_ref, w_ref, b_ref, o_ref):
    # Single K step (tk == full padded D_in): no accumulator, no init/finalize.
    acc = jnp.dot(h_ref[...], w_ref[...], preferred_element_type=jnp.float32)
    o_ref[...] = (acc + b_ref[...]).astype(o_ref.dtype)


def _lens_kernel_acc_f32out(h_ref, w_ref, b_ref, o_ref):
    # Multi-K, f32 output: accumulate straight into the VMEM-resident output tile
    # (its index_map ignores k), saving the tm*tn*4B scratch + finalize copy.
    k = pl.program_id(2)

    @pl.when(k == 0)
    def _():
        o_ref[...] = jnp.broadcast_to(b_ref[...], o_ref.shape)

    o_ref[...] += jnp.dot(h_ref[...], w_ref[...], preferred_element_type=jnp.float32)


def _lens_kernel_acc_scratch(h_ref, w_ref, b_ref, o_ref, acc_ref):
    # Multi-K, low-precision output: f32 scratch accumulator, finalize at last k.
    k = pl.program_id(2)

    @pl.when(k == 0)
    def _():
        acc_ref[...] = jnp.zeros_like(acc_ref)

    acc_ref[...] += jnp.dot(h_ref[...], w_ref[...], preferred_element_type=jnp.float32)

    @pl.when(k == pl.num_programs(2) - 1)
    def _():
        o_ref[...] = (acc_ref[...] + b_ref[...]).astype(o_ref.dtype)


# --------------------------- tile selection -----------------------------------


def _hw_defaults():
    vmem_cap = 128 << 20
    try:
        info = pltpu.get_tpu_info()
        vmem_cap = int(getattr(info, "vmem_capacity_bytes", vmem_cap))
    except Exception:
        pass
    if vmem_cap <= (64 << 20):
        # v7x-class: 64 MiB VMEM per TC, very high HBM BW, 2 TCs per chip.
        return dict(tm=768, tn=1024, tk_cap=4096, vmem_limit=48 << 20)
    # v5e / v6e class (128 MiB VMEM). v6e needs the biggest tiles (worst FLOP/byte ratio).
    return dict(tm=1024, tn=1024, tk_cap=4096, vmem_limit=100 << 20)


# ------------------------------ forward ---------------------------------------


def lens_forward(h, W, b=None, idx=None, *, out_dtype=None,
                 compute_dtype=jnp.bfloat16,
                 tm=None, tn=None, tk=None, use_pallas=None):
    """Affine lens: out[b, s, :] = h[b, s, :] @ W + bias.  `idx` is unused.

    `W` may be a raw (dim_in, dim_out) array (+ `b`) or a pre-built `LensParams`
    (preferred: the pad + cast of the static weight is then done once, not per call).
    """
    del idx  # layer index does not affect the base-class (linear) lens compute

    if isinstance(W, LensParams):
        params = W
    else:
        params = prepare_lens_params(W, b, compute_dtype=compute_dtype)

    B, S, D_in = h.shape
    assert D_in == params.dim_in, "hidden dim mismatch with lens parameters"
    D_out = params.dim_out
    M = B * S
    out_dtype = jnp.dtype(out_dtype) if out_dtype is not None else jnp.dtype(h.dtype)
    cd = jnp.dtype(params.W.dtype)
    cd_size = cd.itemsize
    out_size = out_dtype.itemsize
    K_pad, N_pad = params.W.shape

    # Tiny problems: fixed grid-step/launch overhead dominates -> plain XLA dot.
    if use_pallas is None:
        use_pallas = (M * N_pad) >= (128 * 256)
    if not use_pallas:
        out2d = jnp.dot(h.reshape(M, D_in).astype(cd), params.W[:D_in, :],
                        preferred_element_type=jnp.float32) + params.b[0]
        return out2d[:, :D_out].astype(out_dtype).reshape(B, S, D_out)

    hw = _hw_defaults()
    tm_target = tm if tm is not None else hw["tm"]
    tn_target = tn if tn is not None else hw["tn"]
    tk_target = tk if tk is not None else hw["tk_cap"]
    vmem_limit = hw["vmem_limit"]
    budget = vmem_limit - (4 << 20)   # headroom for compiler-internal scratch

    sub = max(8, 32 // cd_size)       # sublane granularity of the packed compute dtype
    M_aligned = _round_up(M, sub)

    # --- tile selection ---
    tk_eff = _divisor_tile(K_pad, tk_target)   # full K when it fits -> grid_k == 1
    tn_eff = _divisor_tile(N_pad, tn_target)
    if M_aligned <= tm_target:
        tm_eff = M_aligned                      # single i-tile, only sublane padding
    elif tm_target < 256:
        tm_eff = _round_up(tm_target, sub)
    else:
        # multiple-of-256 tile (full MXU passes) minimizing M padding waste
        tm_eff, best_waste = 256, None
        c = 256
        while c <= tm_target:
            waste = _round_up(M_aligned, c) - M_aligned
            if best_waste is None or waste < best_waste or (waste == best_waste and c > tm_eff):
                tm_eff, best_waste = c, waste
            c += 256

    def _multi_k(tk_):
        return (K_pad // tk_) > 1

    def _vmem_use(tm_, tn_, tk_):
        use = 2 * tm_ * tk_ * cd_size          # h tiles (double-buffered)
        use += 2 * tk_ * tn_ * cd_size         # W tiles (double-buffered)
        use += 2 * tn_ * 4                     # bias tiles
        use += 2 * tm_ * tn_ * out_size        # output tiles (double-buffered)
        if _multi_k(tk_) and out_dtype != jnp.float32:
            use += tm_ * tn_ * 4               # f32 accumulator scratch
        return use

    # shrink tiles until they fit the per-generation VMEM budget
    while _vmem_use(tm_eff, tn_eff, tk_eff) > budget:
        if tn_eff > 256:
            tn_eff = _divisor_tile(N_pad, tn_eff - 128)
        elif tm_eff > 256:
            tm_eff = max(256, tm_eff - 256)
        elif tk_eff > 256:
            tk_eff = _divisor_tile(K_pad, tk_eff - 128)
        else:
            break

    M_pad = _round_up(M_aligned, tm_eff)
    grid_i = M_pad // tm_eff
    grid_j = N_pad // tn_eff
    grid_k = K_pad // tk_eff

    # v7x megacore: don't let a single-tile "parallel" grid strand the 2nd TensorCore.
    if grid_i == 1 and grid_j == 1 and N_pad >= 256:
        tn_eff = _divisor_tile(N_pad, N_pad // 2)
        grid_j = N_pad // tn_eff

    # Pad (zeros contribute nothing) and cast the activation; weight is pre-padded/cast.
    h2d = h.reshape(M, D_in)
    if (M_pad, K_pad) != (M, D_in):
        h2d = jnp.pad(h2d, ((0, M_pad - M), (0, K_pad - D_in)))
    h2d = h2d.astype(cd)

    # Cost estimate including the grid re-reads (W read grid_i times, h grid_j times).
    cost = pl.CostEstimate(
        flops=2 * M_pad * K_pad * N_pad,
        transcendentals=0,
        bytes_accessed=(grid_j * M_pad * K_pad * cd_size
                        + grid_i * K_pad * N_pad * cd_size
                        + M_pad * N_pad * out_size
                        + N_pad * 4),
    )

    # TODO(synk): sweep pipeline_mode=pl.Buffered(3) on the W BlockSpec on v7x if an
    # xprof trace shows exposed DMA between (i, j) steps once the K axis collapses.
    if grid_k == 1:
        grid = (grid_i, grid_j)
        in_specs = [
            pl.BlockSpec((tm_eff, tk_eff), lambda i, j: (i, 0)),   # h tile
            pl.BlockSpec((tk_eff, tn_eff), lambda i, j: (0, j)),   # W tile
            pl.BlockSpec((1, tn_eff), lambda i, j: (0, j)),        # bias tile
        ]
        out_spec = pl.BlockSpec((tm_eff, tn_eff), lambda i, j: (i, j))
        kernel = _lens_kernel_fused
        scratch = ()
        dims = ("parallel", "parallel")
    else:
        grid = (grid_i, grid_j, grid_k)
        in_specs = [
            pl.BlockSpec((tm_eff, tk_eff), lambda i, j, k: (i, k)),
            pl.BlockSpec((tk_eff, tn_eff), lambda i, j, k: (k, j)),
            pl.BlockSpec((1, tn_eff), lambda i, j, k: (0, j)),
        ]
        out_spec = pl.BlockSpec((tm_eff, tn_eff), lambda i, j, k: (i, j))
        dims = ("parallel", "parallel", "arbitrary")
        if out_dtype == jnp.float32:
            kernel = _lens_kernel_acc_f32out
            scratch = ()
        else:
            kernel = _lens_kernel_acc_scratch
            scratch = (pltpu.VMEM((tm_eff, tn_eff), jnp.float32),)

    out2d = pl.pallas_call(
        kernel,
        out_shape=jax.ShapeDtypeStruct((M_pad, N_pad), out_dtype),
        grid_spec=pltpu.PrefetchScalarGridSpec(
            num_scalar_prefetch=0,
            grid=grid,
            in_specs=in_specs,
            out_specs=out_spec,
            scratch_shapes=list(scratch),
        ),
        compiler_params=pltpu.CompilerParams(
            dimension_semantics=dims,
            vmem_limit_bytes=vmem_limit,
        ),
        cost_estimate=cost,
    )(h2d, params.W, params.b)

    return out2d[:M, :D_out].reshape(B, S, D_out)


# TODO(synk): Lens.to()/device bookkeeping and from_model()/set_parameters() are
# host-side plumbing with no device compute; only forward() is implemented here.


if __name__ == "__main__":
    key = jax.random.PRNGKey(0)
    k_h, k_w, k_b, k_h2, k_w2, k_b2 = jax.random.split(key, 6)

    # --- Test 1: aligned shapes, pre-prepared (hoisted) params, fused single-K path. ---
    batch, seq, dim_in, dim_out = 2, 128, 256, 512
    h = jax.random.normal(k_h, (batch, seq, dim_in), dtype=jnp.float32)
    W = jax.random.normal(k_w, (dim_in, dim_out), dtype=jnp.float32) * 0.02
    b = jax.random.normal(k_b, (dim_out,), dtype=jnp.float32) * 0.02

    params = prepare_lens_params(W, b)            # pad + bf16 cast once
    out = lens_forward(h, params, idx=0, use_pallas=True)
    jax.block_until_ready(out)
    ref = (h.reshape(-1, dim_in) @ W + b).reshape(batch, seq, dim_out)
    assert out.shape == (batch, seq, dim_out)
    assert jnp.allclose(out, ref, atol=2e-2, rtol=2e-2), "test1 mismatch"

    # --- Test 2: unaligned shapes (raw W/b path) -> pad/slice tail, multi-tile j grid. ---
    batch2, seq2, din2, dout2 = 2, 100, 200, 300
    h2 = jax.random.normal(k_h2, (batch2, seq2, din2), dtype=jnp.float32)
    W2 = jax.random.normal(k_w2, (din2, dout2), dtype=jnp.float32) * 0.02
    b2 = jax.random.normal(k_b2, (dout2,), dtype=jnp.float32) * 0.02

    out2 = lens_forward(h2, W2, b2, idx=3, use_pallas=True)
    jax.block_until_ready(out2)
    ref2 = (h2.reshape(-1, din2) @ W2 + b2).reshape(batch2, seq2, dout2)
    assert out2.shape == (batch2, seq2, dout2)
    assert jnp.allclose(out2, ref2, atol=2e-2, rtol=2e-2), "test2 mismatch"

    # --- Test 3: forced multi-K (small tk) + f32 output -> direct-accumulate kernel. ---
    out3 = lens_forward(h, params, idx=1, tm=128, tn=128, tk=128, use_pallas=True)
    jax.block_until_ready(out3)
    assert jnp.allclose(out3, ref, atol=2e-2, rtol=2e-2), "test3 mismatch"

    # --- Test 4: forced multi-K + bf16 output -> f32-scratch accumulator kernel. ---
    out4 = lens_forward(h, params, idx=2, out_dtype=jnp.bfloat16,
                        tm=128, tn=128, tk=128, use_pallas=True)
    jax.block_until_ready(out4)
    assert out4.dtype == jnp.bfloat16
    assert jnp.allclose(out4.astype(jnp.float32), ref, atol=5e-2, rtol=5e-2), "test4 mismatch"

    print("KERNEL_OK")
</pallas_src>

<mosaic_0001>
module attributes {stable_mosaic.version = 11 : i64} {
  func.func @_lens_kernel_fused(%arg0: i32, %arg1: i32, %arg2: memref<256x256xbf16, #tpu.memory_space<vmem>>, %arg3: memref<256x256xbf16, #tpu.memory_space<vmem>>, %arg4: memref<1x256xf32, #tpu.memory_space<vmem>>, %arg5: memref<256x256xf32, #tpu.memory_space<vmem>>) attributes {dimension_semantics = [#tpu.dimension_semantics<parallel>, #tpu.dimension_semantics<parallel>], iteration_bounds = array<i64: 1, 2>, scalar_prefetch = 0 : i64, scratch_operands = 0 : i64, tpu.core_type = #tpu.core_type<tc>, window_params = [{transform_indices = @transform_0, window_bounds = array<i64: 256, 256>}, {transform_indices = @transform_1, window_bounds = array<i64: 256, 256>}, {transform_indices = @transform_2, window_bounds = array<i64: 1, 256>}, {transform_indices = @transform_3, window_bounds = array<i64: 256, 256>}]} {
    %c0 = arith.constant 0 : index
    %c0_0 = arith.constant 0 : index
    %0 = vector.load %arg2[%c0, %c0_0] : memref<256x256xbf16, #tpu.memory_space<vmem>>, vector<256x256xbf16>
    %c0_1 = arith.constant 0 : index
    %c0_2 = arith.constant 0 : index
    %1 = vector.load %arg3[%c0_1, %c0_2] : memref<256x256xbf16, #tpu.memory_space<vmem>>, vector<256x256xbf16>
    %cst = arith.constant dense<0.000000e+00> : vector<256x256xf32>
    %2 = tpu.matmul %0, %1, %cst {dimension_numbers = #tpu.dot_dimension_numbers<[1], [0], [0], [1], [0, 0, 1, 1], [], []>} : vector<256x256xbf16>, vector<256x256xbf16>, vector<256x256xf32> -> vector<256x256xf32>
    %c0_3 = arith.constant 0 : index
    %c0_4 = arith.constant 0 : index
    %3 = vector.load %arg4[%c0_3, %c0_4] : memref<1x256xf32, #tpu.memory_space<vmem>>, vector<1x256xf32>
    %4 = vector.broadcast %3 : vector<1x256xf32> to vector<256x256xf32>
    %5 = arith.addf %2, %4 : vector<256x256xf32>
    %c0_5 = arith.constant 0 : index
    %c0_6 = arith.constant 0 : index
    %6 = vector.load %arg5[%c0_5, %c0_6] : memref<256x256xf32, #tpu.memory_space<vmem>>, vector<256x256xf32>
    tpu.vector_store %arg5[%c0_5, %c0_6], %5 {strides = array<i32>} : memref<256x256xf32, #tpu.memory_space<vmem>>, vector<256x256xf32>,
    return
  }
  func.func @transform_0(%arg0: i32, %arg1: i32) -> (i32, i32) {
    %c0_i32 = arith.constant 0 : i32
    %c0_i32_0 = arith.constant 0 : i32
    return %arg0, %c0_i32 : i32, i32
  }
  func.func @transform_1(%arg0: i32, %arg1: i32) -> (i32, i32) {
    %c0_i32 = arith.constant 0 : i32
    %c0_i32_0 = arith.constant 0 : i32
    return %c0_i32, %arg1 : i32, i32
  }
  func.func @transform_2(%arg0: i32, %arg1: i32) -> (i32, i32) {
    %c0_i32 = arith.constant 0 : i32
    %c0_i32_0 = arith.constant 0 : i32
    return %c0_i32, %arg1 : i32, i32
  }
  func.func @transform_3(%arg0: i32, %arg1: i32) -> (i32, i32) {
    %c0_i32 = arith.constant 0 : i32
    return %arg0, %arg1 : i32, i32
  }
}

</mosaic_0001>

<bundles_post_ra>
// kernel: tpu_custom_call.1
= control target key start
LH: loop header
LB: loop body
LE: loop exit
PB: predicated region body
PF: predicated region fallthrough
CT: control target
= control target key end

     0   :  { %s2228_s0 = inlined_call_operand.hbm [shape: bf16[256,256], index: 0, kind: input, shape index: {}]   ;;  %s2229_s1 = inlined_call_operand.hbm [shape: bf16[256,512], index: 1, kind: input, shape index: {}]   ;;  %s2230_s2 = inlined_call_operand.hbm [shape: f32[1,512], index: 2, kind: input, shape index: {}]   ;;  %s2231_s3 = inlined_call_operand.hbm [shape: f32[256,512], index: 3, kind: output, shape index: {}]  }
   0x1   :  { %2234 = sst [smem:[#allocation12_spill]] %s2228_s0 }
   0x2   :  { %2235 = sst [smem:[#allocation13_spill]] %s2229_s1 }
   0x3   :  { %8 = vsyncpa [#allocation3], 0 }
   0x4   :  { %9 = vsyncpa [#allocation6], 0 }
   0x5   :  { %11 = vsyncpa [#allocation6 + $0x1], 0 }
   0x6   :  { %12 = vsyncpa [#allocation4], 0 }
   0x7   :  { %14 = vsyncpa [#allocation4 + $0x1], 0  ;;  %s1850_s12 = smov 0   ;;  %s1852_s13 = smov 0  }
   0x8   :  { %s1854_s14 = smov 0   ;;  %s1856_s15 = smov 0  }
   0x9   :  { %s1858_s16 = smov 0   ;;  %s1860_s17 = smov 0  }
   0xa LB: > { %s29_s18 = sadd.s32 1, %s1817_s16  ;;  %s65_s19 = sadd.s32 1, %s1809_s14  ;;  %s1821_s17 = sphi %s1860_s17, %s20_s17   ;;  %s1817_s16 = sphi %s1858_s16, %s2250_s16   ;;  %s1813_s15 = sphi %s1856_s15, %s2249_s15   ;;  %s1809_s14 = sphi %s1854_s14, %s2248_s14   ;;  %s1805_s13 = sphi %s1852_s13, %s2247_s13   ;;  %s1801_s12 = sphi %s1850_s12, %s2246_s12  }
   0xb   : > { %p30_p0 = scmp.ge.s32.totalorder %s29_s18, 2  ;;  %p72_p1 = scmp.ne.s32.totalorder %s1809_s14, %s1805_s13 }
   0xc   : > { %p73_p2 = scmp.eq.s32.totalorder %s1821_s17, 0  ;;  %p1223_p4 = scmp.ge.s32.totalorder %s1821_s17, 2 }
   0xd   : > { %s2252_s18 = smov (%p30_p0, %s29_s18), 0  ;;  %p1587_p6 = scmp.lt.s32.totalorder %s1821_s17, 2 }
   0xe   : > { %p1890_p3 = por %p73_p2, %p72_p1  ;;  %s62_s21 = ssub.s32 %s1817_s16, %s2252_s18 }
   0xf   : > { %p63_p5 = scmp.eq.s32.totalorder %s62_s21, 0  ;;  %s174_s22 = sand.u32 1, %s1821_s17  }
  0x10   : > { %s176_s23 = sand.u32 1, %s1809_s14   ;;  %s1495_s26 = sshll.u32 %s1817_s16, 3 }
  0x11   : > { %s1901_s24 = scalar_select %p63_p5, %s1809_s14, %s65_s19  }
  0x12   : > { %s1224_s25 = sshll.u32 %s176_s23, 8  ;;  %s2237_s1 = sld [smem:[#allocation13_spill]] }
  0x13   : > { %s178_s30 = scalar_lea.vmem [#allocation5], %s1224_s25  ;;  %p1911_p7 = pnand %p1587_p6, %p1890_p3 }
  0x14   : > { %s186_s4 = sshll.u32 %s178_s30, 4  ;;  %s1915_s7 = scalar_lea.sflag [#allocation6], %s174_s22  ;;  %s187_s4 = int_to_ptr.vmem [resolvable:$true] %s186_s4 }
  0x15   : > { %s1823_s8 = smov 256   ;;  %s2232_s9 = smov 128  }
  0x16   : > { %s2233_s10 = smov 8   ;;  %s1923_s11 = sadd.s32 4294967295, %s1821_s17  }
  0x17   : > { %s1220_s19 = sadd.s32 4294967294, %s1821_s17   ;;  %p78_p8 = scmp.ne.s32.totalorder %s1805_s13, %s1801_s12 }
  0x18   : > { %s183_s29 = scalar_lea.hbm %s2237_s1, %s1495_s26  ;;  %p79_p9 = scmp.eq.s32.totalorder %s1923_s11, 0 }
  0x19   : > { %s184_s5 = sshll.u32 %s183_s29, 4  ;;  %p130_p10 = scmp.eq.s32.totalorder %s1923_s11, 1  ;;  %s185_s5 = int_to_ptr.hbm [resolvable:$true] %s184_s5 }
  0x1a   : > { %1578 = dma.hbm_to_vmem [thread:$0]  (!%p1911_p7), %s185_s5, 4096, %s187_s4, %s1915_s7, %s1823_s8, %s2232_s9, %s2233_s10  }
  0x1b   : > { %p136_p11 = scmp.eq.s32.totalorder %s1220_s19, 1  ;;  %p1932_p12 = por %p79_p9, %p78_p8 }
  0x1c   : > { %p1221_p13 = scmp.ge.s32.totalorder %s1821_s17, 1  ;;  %p1940_p0 = por %p130_p10, %p72_p1 }
  0x1d   : > { %p1944_p2 = por %p136_p11, %p78_p8  ;;  %p143_p3 = scmp.lt.s32.totalorder %s1821_s17, 3 }
  0x1e   : > { %s2242_s0 = sld [smem:[#allocation12_spill]]  ;;  %s1826_s29 = smov [#allocation2]  }
  0x1f   : > { %p1952_p5 = pnand %p1221_p13, %p143_p3  ;;  %s160_s30 = sshll.u32 %s1826_s29, 4  ;;  %s161_s30 = int_to_ptr.vmem [resolvable:$true] %s160_s30 }
  0x20   : > { %s1227_s4 = sshll.u32 %s176_s23, 1  ;;  %s1228_s5 = sshll.u32 %s1817_s16, 1 }
  0x21   : > { %p1571_p1 = pneg %p1952_p5  ;;  %s204_s25 = scalar_lea.hbm %s2230_s2, %s1228_s5 }
  0x22   : > { %s206_s26 = sshll.u32 %s204_s25, 4  ;;  %s200_s9 = scalar_lea.vmem [#allocation7], %s1227_s4  ;;  %s207_s26 = int_to_ptr.hbm [resolvable:$true] %s206_s26 }
  0x23   : > { %p1572_p6 = pnand %p1571_p1, %p79_p9  ;;  %s208_s10 = sshll.u32 %s200_s9, 4  ;;  %s209_s10 = int_to_ptr.vmem [resolvable:$true] %s208_s10 }
  0x24   : > { %s158_s27 = sshll.u32 %s2242_s0, 4  ;;  %s2244_s0 = smov 8   ;;  %s159_s27 = int_to_ptr.hbm [resolvable:$true] %s158_s27 }
  0x25   : > { %s2245_s1 = smov 128   ;;  %217 = sbr.rel (%p1952_p5) target bundleno = 472 (0x1d8), region = 32 }
  0x26   : > { %1574 = dma.hbm_to_vmem [thread:$0]  (!%p1572_p6), %s159_s27, 4096, %s161_s30, [#allocation3], %s2245_s1, %s2245_s1, %s2244_s0  }
  0x27   : > { %1581 = dma.hbm_to_vmem [thread:$0]  (!%p1911_p7), %s207_s26, 32, %s209_s10, %s1915_s7  }
  0x2a   : > { %1788 = dma.done.wait (%p79_p9), [#allocation3], 4096  }
  0x2b   : > { %1790 = vsyncadd (%p79_p9), [#allocation3], 4294963200  ;;  %s224_s23 = sand.u32 1, %s1923_s11   ;;  %s1980_s9 = sand.u32 1, %s1805_s13  }
  0x2c   : > { %s1231_s0 = sshll.u32 %s1980_s9, 8  ;;  %s225_s1 = scalar_lea.sflag [#allocation6], %s224_s23 }
  0x2d   : > { %s1983_s6 = scalar_lea.vmem [#allocation5], %s1231_s0 }
  0x2e   : > { %1792 = dma.done.wait (%p1932_p12), %s225_s1, 4128  }
  0x2f   : > { %1794 = vsyncadd (%p1932_p12), %s225_s1, 4294963168  ;;  %v1420_v0 = vld [vmem:[%s1983_s6 + $0x70] sm:$0xf]  ;;  %v1543_v1 = vld [vmem:[%s1983_s6 + $0x74] sm:$0xf0]  ;;  %s1232_s7 = sshll.u32 %s1980_s9, 1 }
  0x30   : > { %v1484_v2 = vld [vmem:[%s1983_s6 + $0xf0] sm:$0xf]  ;;  %v1421_v3 = vor.u32 %v1543_v1, %v1420_v0  ;;  %v1559_v4 = vld [vmem:[%s1983_s6 + $0xf4] sm:$0xf0]  ;;  %v1542_v5 = vld [vmem:[%s1983_s6 + $0x74] sm:$0xf] }
  0x31   : > { %v1422_v6 = vld [vmem:[%s1983_s6 + $0x78] sm:$0xf0]  ;;  %v1485_v7 = vor.u32 %v1559_v4, %v1484_v2  ;;  %v1558_v9 = vld [vmem:[%s1983_s6 + $0xf4] sm:$0xf]  ;;  %v1412_v11 = vld [vmem:[%s1983_s6 + $0x60] sm:$0xf] }
  0x32   : > { %v1425_v8 = vor.u32 %v1542_v5, %v1422_v6  ;;  %v1486_v10 = vld [vmem:[%s1983_s6 + $0xf8] sm:$0xf0]  ;;  %662 = vmatpush.bf16.msra.mxu0 %v1421_v3  ;;  %v1541_v13 = vld [vmem:[%s1983_s6 + $0x64] sm:$0xf0]  ;;  %v1476_v14 = vld [vmem:[%s1983_s6 + $0xe0] sm:$0xf] }
  0x33   : > { %v1489_v12 = vor.u32 %v1558_v9, %v1486_v10  ;;  %v1557_v15 = vld [vmem:[%s1983_s6 + $0xe4] sm:$0xf0]  ;;  %751 = vmatpush.bf16.msra.mxu1 %v1485_v7  ;;  %v1413_v16 = vor.u32 %v1541_v13, %v1412_v11  ;;  %v1540_v18 = vld [vmem:[%s1983_s6 + $0x64] sm:$0xf]  ;;  %v1414_v19 = vld [vmem:[%s1983_s6 + $0x68] sm:$0xf0] }
  0x34   : > { %840 = vmatpush.bf16.msra.mxu2 %v1425_v8  ;;  %v1477_v17 = vor.u32 %v1557_v15, %v1476_v14  ;;  %v1556_v20 = vld [vmem:[%s1983_s6 + $0xe4] sm:$0xf]  ;;  %v1417_v21 = vor.u32 %v1540_v18, %v1414_v19  ;;  %v1478_v22 = vld [vmem:[%s1983_s6 + $0xe8] sm:$0xf0]  ;;  %v1404_v23 = vld [vmem:[%s1983_s6 + $0x50] sm:$0xf] }
  0x35   : > { %929 = vmatpush.bf16.msra.mxu3 %v1489_v12  ;;  %v1539_v24 = vld [vmem:[%s1983_s6 + $0x54] sm:$0xf0]  ;;  %v1481_v25 = vor.u32 %v1556_v20, %v1478_v22  ;;  %v1468_v26 = vld [vmem:[%s1983_s6 + $0xd0] sm:$0xf]  ;;  %v1538_v28 = vld [vmem:[%s1983_s6 + $0x54] sm:$0xf] }
  0x36   : > { %v1555_v27 = vld [vmem:[%s1983_s6 + $0xd4] sm:$0xf0]  ;;  %663 = vmatpush.bf16.msra.mxu0 %v1413_v16  ;;  %v1405_v29 = vor.u32 %v1539_v24, %v1404_v23  ;;  %v1406_v30 = vld [vmem:[%s1983_s6 + $0x58] sm:$0xf0]  ;;  %v1554_v31 = vld [vmem:[%s1983_s6 + $0xd4] sm:$0xf] }
  0x37   : > { %v1470_v32 = vld [vmem:[%s1983_s6 + $0xd8] sm:$0xf0]  ;;  %752 = vmatpush.bf16.msra.mxu1 %v1477_v17  ;;  %v1469_v33 = vor.u32 %v1555_v27, %v1468_v26  ;;  %v1409_v34 = vor.u32 %v1538_v28, %v1406_v30  ;;  %v1396_v35 = vld [vmem:[%s1983_s6 + $0x40] sm:$0xf]  ;;  %v1537_v36 = vld [vmem:[%s1983_s6 + $0x44] sm:$0xf0] }
  0x38   : > { %841 = vmatpush.bf16.msra.mxu2 %v1417_v21  ;;  %v1460_v37 = vld [vmem:[%s1983_s6 + $0xc0] sm:$0xf]  ;;  %v1473_v38 = vor.u32 %v1554_v31, %v1470_v32  ;;  %v1553_v39 = vld [vmem:[%s1983_s6 + $0xc4] sm:$0xf0]  ;;  %v1536_v40 = vld [vmem:[%s1983_s6 + $0x44] sm:$0xf]  ;;  %v1397_v44 = vor.u32 %v1537_v36, %v1396_v35 }
  0x39   : > { %930 = vmatpush.bf16.msra.mxu3 %v1481_v25  ;;  %v1398_v41 = vld [vmem:[%s1983_s6 + $0x48] sm:$0xf0]  ;;  %v1552_v42 = vld [vmem:[%s1983_s6 + $0xc4] sm:$0xf]  ;;  %v1461_v45 = vor.u32 %v1553_v39, %v1460_v37  ;;  %v1388_v47 = vld [vmem:[%s1983_s6 + $0x30] sm:$0xf] }
  0x3a   : > { %v1462_v43 = vld [vmem:[%s1983_s6 + $0xc8] sm:$0xf0]  ;;  %664 = vmatpush.bf16.msra.mxu0 %v1405_v29  ;;  %v1401_v46 = vor.u32 %v1536_v40, %v1398_v41  ;;  %v1535_v48 = vld [vmem:[%s1983_s6 + $0x34] sm:$0xf0]  ;;  %v1452_v49 = vld [vmem:[%s1983_s6 + $0xb0] sm:$0xf] }
  0x3b   : > { %753 = vmatpush.bf16.msra.mxu1 %v1469_v33  ;;  %v1465_v50 = vor.u32 %v1552_v42, %v1462_v43  ;;  %v1551_v51 = vld [vmem:[%s1983_s6 + $0xb4] sm:$0xf0]  ;;  %v1534_v52 = vld [vmem:[%s1983_s6 + $0x34] sm:$0xf]  ;;  %v1390_v53 = vld [vmem:[%s1983_s6 + $0x38] sm:$0xf0]  ;;  %v1389_v56 = vor.u32 %v1535_v48, %v1388_v47 }
  0x3c   : > { %842 = vmatpush.bf16.msra.mxu2 %v1409_v34  ;;  %v1550_v54 = vld [vmem:[%s1983_s6 + $0xb4] sm:$0xf]  ;;  %v1454_v55 = vld [vmem:[%s1983_s6 + $0xb8] sm:$0xf0]  ;;  %v1453_v57 = vor.u32 %v1551_v51, %v1452_v49  ;;  %v1393_v58 = vor.u32 %v1534_v52, %v1390_v53  ;;  %v1380_v59 = vld [vmem:[%s1983_s6 + $0x20] sm:$0xf] }
  0x3d   : > { %931 = vmatpush.bf16.msra.mxu3 %v1473_v38  ;;  %v1533_v60 = vld [vmem:[%s1983_s6 + $0x24] sm:$0xf0]  ;;  %v1444_v61 = vld [vmem:[%s1983_s6 + $0xa0] sm:$0xf]  ;;  %v1457_v62 = vor.u32 %v1550_v54, %v1454_v55  ;;  %v1532_v0 = vld [vmem:[%s1983_s6 + $0x24] sm:$0xf] }
  0x3e   : > { %665 = vmatpush.bf16.msra.mxu0 %v1397_v44  ;;  %v1549_v63 = vld [vmem:[%s1983_s6 + $0xa4] sm:$0xf0]  ;;  %v1382_v1 = vld [vmem:[%s1983_s6 + $0x28] sm:$0xf0]  ;;  %v1548_v2 = vld [vmem:[%s1983_s6 + $0xa4] sm:$0xf]  ;;  %v1381_v4 = vor.u32 %v1533_v60, %v1380_v59 }
  0x3f   : > { %754 = vmatpush.bf16.msra.mxu1 %v1461_v45  ;;  %v1446_v3 = vld [vmem:[%s1983_s6 + $0xa8] sm:$0xf0]  ;;  %v1445_v5 = vor.u32 %v1549_v63, %v1444_v61  ;;  %v1385_v6 = vor.u32 %v1532_v0, %v1382_v1  ;;  %v1372_v7 = vld [vmem:[%s1983_s6 + $0x10] sm:$0xf]  ;;  %v1531_v8 = vld [vmem:[%s1983_s6 + $0x14] sm:$0xf0] }
  0x40   : > { %843 = vmatpush.bf16.msra.mxu2 %v1401_v46  ;;  %v1436_v9 = vld [vmem:[%s1983_s6 + $0x90] sm:$0xf]  ;;  %v1449_v10 = vor.u32 %v1548_v2, %v1446_v3  ;;  %v1547_v11 = vld [vmem:[%s1983_s6 + $0x94] sm:$0xf0]  ;;  %v1530_v12 = vld [vmem:[%s1983_s6 + $0x14] sm:$0xf]  ;;  %v1373_v16 = vor.u32 %v1531_v8, %v1372_v7 }
  0x41   : > { %932 = vmatpush.bf16.msra.mxu3 %v1465_v50  ;;  %v1374_v13 = vld [vmem:[%s1983_s6 + $0x18] sm:$0xf0]  ;;  %v1546_v14 = vld [vmem:[%s1983_s6 + $0x94] sm:$0xf]  ;;  %v1437_v17 = vor.u32 %v1547_v11, %v1436_v9  ;;  %v1364_v19 = vld [vmem:[%s1983_s6] sm:$0xf] }
  0x42   : > { %666 = vmatpush.bf16.msra.mxu0 %v1389_v56  ;;  %v1438_v15 = vld [vmem:[%s1983_s6 + $0x98] sm:$0xf0]  ;;  %v1377_v18 = vor.u32 %v1530_v12, %v1374_v13  ;;  %v1529_v20 = vld [vmem:[%s1983_s6 + $0x4] sm:$0xf0]  ;;  %v1428_v21 = vld [vmem:[%s1983_s6 + $0x80] sm:$0xf] }
  0x43   : > { %755 = vmatpush.bf16.msra.mxu1 %v1453_v57  ;;  %v1441_v22 = vor.u32 %v1546_v14, %v1438_v15  ;;  %v1545_v23 = vld [vmem:[%s1983_s6 + $0x84] sm:$0xf0]  ;;  %v1528_v24 = vld [vmem:[%s1983_s6 + $0x4] sm:$0xf]  ;;  %v1366_v25 = vld [vmem:[%s1983_s6 + $0x8] sm:$0xf0]  ;;  %v1365_v28 = vor.u32 %v1529_v20, %v1364_v19 }
  0x44   : > { %844 = vmatpush.bf16.msra.mxu2 %v1393_v58  ;;  %v1544_v26 = vld [vmem:[%s1983_s6 + $0x84] sm:$0xf]  ;;  %v1430_v27 = vld [vmem:[%s1983_s6 + $0x88] sm:$0xf0]  ;;  %v1236_v29 = vld [vmem:[#allocation2] sm:$0xf]  ;;  %v1429_v31 = vor.u32 %v1545_v23, %v1428_v21  ;;  %v1369_v32 = vor.u32 %v1528_v24, %v1366_v25 }
  0x45   : > { %933 = vmatpush.bf16.msra.mxu3 %v1457_v62  ;;  %v1497_v30 = vld [vmem:[#allocation2 + $0x4] sm:$0xf0]  ;;  %v1496_v33 = vld [vmem:[#allocation2 + $0x4] sm:$0xf]  ;;  %v1238_v34 = vld [vmem:[#allocation2 + $0x8] sm:$0xf0]  ;;  %v1433_v35 = vor.u32 %v1544_v26, %v1430_v27 }
  0x46   : > { %667 = vmatpush.bf16.msra.mxu0 %v1381_v4  ;;  %v1237_v36 = vor.u32 %v1497_v30, %v1236_v29  ;;  %v1241_v37 = vor.u32 %v1496_v33, %v1238_v34  ;;  %v1244_v38 = vld [vmem:[#allocation2 + $0x10] sm:$0xf]  ;;  %v1499_v39 = vld [vmem:[#allocation2 + $0x14] sm:$0xf0]  ;;  %v1498_v40 = vld [vmem:[#allocation2 + $0x14] sm:$0xf] }
  0x47   : > { %756 = vmatpush.bf16.msra.mxu1 %v1445_v5  ;;  %v1246_v41 = vld [vmem:[#allocation2 + $0x18] sm:$0xf0]  ;;  %v1245_v42 = vor.u32 %v1499_v39, %v1244_v38  ;;  %v1252_v44 = vld [vmem:[#allocation2 + $0x20] sm:$0xf]  ;;  %v1501_v45 = vld [vmem:[#allocation2 + $0x24] sm:$0xf0] }
  0x48   : > { %845 = vmatpush.bf16.msra.mxu2 %v1385_v6  ;;  %v1249_v43 = vor.u32 %v1498_v40, %v1246_v41  ;;  %v1500_v46 = vld [vmem:[#allocation2 + $0x24] sm:$0xf]  ;;  %v1254_v47 = vld [vmem:[#allocation2 + $0x28] sm:$0xf0]  ;;  %v1253_v48 = vor.u32 %v1501_v45, %v1252_v44  ;;  %v1260_v50 = vld [vmem:[#allocation2 + $0x30] sm:$0xf] }
  0x49   : > { %934 = vmatpush.bf16.msra.mxu3 %v1449_v10  ;;  %v1257_v49 = vor.u32 %v1500_v46, %v1254_v47  ;;  %v1503_v51 = vld [vmem:[#allocation2 + $0x34] sm:$0xf0]  ;;  %v1502_v52 = vld [vmem:[#allocation2 + $0x34] sm:$0xf]  ;;  %v1262_v53 = vld [vmem:[#allocation2 + $0x38] sm:$0xf0] }
  0x4a   : > { %668 = vmatpush.bf16.msra.mxu0 %v1373_v16  ;;  %v1261_v54 = vor.u32 %v1503_v51, %v1260_v50  ;;  %v1265_v55 = vor.u32 %v1502_v52, %v1262_v53  ;;  %v1268_v56 = vld [vmem:[#allocation2 + $0x40] sm:$0xf]  ;;  %v1505_v57 = vld [vmem:[#allocation2 + $0x44] sm:$0xf0]  ;;  %v1504_v58 = vld [vmem:[#allocation2 + $0x44] sm:$0xf] }
  0x4b   : > { %757 = vmatpush.bf16.msra.mxu1 %v1437_v17  ;;  %v1270_v59 = vld [vmem:[#allocation2 + $0x48] sm:$0xf0]  ;;  %v1269_v60 = vor.u32 %v1505_v57, %v1268_v56  ;;  %v1276_v62 = vld [vmem:[#allocation2 + $0x50] sm:$0xf]  ;;  %v1507_v63 = vld [vmem:[#allocation2 + $0x54] sm:$0xf0] }
  0x4c   : > { %846 = vmatpush.bf16.msra.mxu2 %v1377_v18  ;;  %v1273_v61 = vor.u32 %v1504_v58, %v1270_v59  ;;  %v1506_v0 = vld [vmem:[#allocation2 + $0x54] sm:$0xf]  ;;  %v1278_v1 = vld [vmem:[#allocation2 + $0x58] sm:$0xf0]  ;;  %v1277_v2 = vor.u32 %v1507_v63, %v1276_v62  ;;  %v1284_v4 = vld [vmem:[#allocation2 + $0x60] sm:$0xf] }
  0x4d   : > { %935 = vmatpush.bf16.msra.mxu3 %v1441_v22  ;;  %v1281_v3 = vor.u32 %v1506_v0, %v1278_v1  ;;  %v1509_v5 = vld [vmem:[#allocation2 + $0x64] sm:$0xf0]  ;;  %v1508_v6 = vld [vmem:[#allocation2 + $0x64] sm:$0xf]  ;;  %v1286_v7 = vld [vmem:[#allocation2 + $0x68] sm:$0xf0] }
  0x4e   : > { %669 = vmatpush.bf16.msra.mxu0 %v1365_v28  ;;  %v1285_v8 = vor.u32 %v1509_v5, %v1284_v4  ;;  %v1289_v9 = vor.u32 %v1508_v6, %v1286_v7  ;;  %v1292_v10 = vld [vmem:[#allocation2 + $0x70] sm:$0xf]  ;;  %v1511_v11 = vld [vmem:[#allocation2 + $0x74] sm:$0xf0]  ;;  %v1510_v12 = vld [vmem:[#allocation2 + $0x74] sm:$0xf] }
  0x4f   : > { %758 = vmatpush.bf16.msra.mxu1 %v1429_v31  ;;  %v1294_v13 = vld [vmem:[#allocation2 + $0x78] sm:$0xf0]  ;;  %v1293_v14 = vor.u32 %v1511_v11, %v1292_v10  ;;  %s238_s10 = scalar_lea.vmem [#allocation7], %s1232_s7  ;;  %v1300_v17 = vld [vmem:[#allocation2 + $0x80] sm:$0xf]  ;;  %s1233_s11 = sshll.u32 %s1980_s9, 9 }
  0x50   : > { %847 = vmatpush.bf16.msra.mxu2 %v1369_v32  ;;  %v1297_v15 = vor.u32 %v1510_v12, %v1294_v13  ;;  %v336_v16 = vld [vmem:[%s238_s10] sm:$0x3]  ;;  %v1513_v18 = vld [vmem:[#allocation2 + $0x84] sm:$0xf0]  ;;  %v1512_v20 = vld [vmem:[#allocation2 + $0x84] sm:$0xf] }
  0x51   : > { %936 = vmatpush.bf16.msra.mxu3 %v1433_v35  ;;  %670 = vmatmul.bf16.vlgmr.msra.gmra.mxu0 %v1237_v36  ;;  %v2054_v19 = vperm.slane %v336_v16, 0  ;;  %v1302_v21 = vld [vmem:[#allocation2 + $0x88] sm:$0xf0]  ;;  %v1301_v22 = vor.u32 %v1513_v18, %v1300_v17  ;;  %v2058_v28 = vperm.slane %v336_v16, 1  ;;  %s2060_s20 = scalar_lea.vmem [#allocation8], %s1233_s11  ;;  %s1560_s27 = sshll.u32 %s1813_s15, 4 }
  0x52   : > { %759 = vmatmul.bf16.vlgmr.msra.gmra.mxu1 %v1241_v37  ;;  %v1305_v24 = vor.u32 %v1512_v20, %v1302_v21  ;;  %v1515_v38 = vld [vmem:[#allocation2 + $0x94] sm:$0xf0]  ;;  %v1514_v39 = vld [vmem:[#allocation2 + $0x94] sm:$0xf]  ;;  %v1310_v40 = vld [vmem:[#allocation2 + $0x98] sm:$0xf0]  ;;  %s1097_s30 = scalar_lea.hbm %s2231_s3, %s1560_s27 }
  0x53   : > { %848 = vmatmul.bf16.vlgmr.msra.gmra.mxu2 %v1237_v36  ;;  %v1313_v46 = vor.u32 %v1514_v39, %v1310_v40  ;;  %v1316_v59 = vld [vmem:[#allocation2 + $0xa0] sm:$0xf]  ;;  %v1318_v62 = vld [vmem:[#allocation2 + $0xa8] sm:$0xf0]  ;;  %v1324_v17 = vld [vmem:[#allocation2 + $0xb0] sm:$0xf] }
  0x54   : > { %937 = vmatmul.bf16.vlgmr.msra.gmra.mxu3 %v1241_v37  ;;  %v1308_v37 = vld [vmem:[#allocation2 + $0x90] sm:$0xf]  ;;  %v1519_v18 = vld [vmem:[#allocation2 + $0xb4] sm:$0xf0]  ;;  %v1518_v20 = vld [vmem:[#allocation2 + $0xb4] sm:$0xf] }
  0x55   : > { %v1326_v21 = vld [vmem:[#allocation2 + $0xb8] sm:$0xf0]  ;;  %s1098_s4 = sshll.u32 %s2060_s20, 4  ;;  %s1100_s5 = sshll.u32 %s1097_s30, 4  ;;  %s1099_s4 = int_to_ptr.vmem [resolvable:$true] %s1098_s4  ;;  %s1101_s5 = int_to_ptr.hbm [resolvable:$true] %s1100_s5 }
  0x56   : > { %s1083_s15 = scalar_lea.sflag [#allocation4], %s1980_s9  ;;  %s1749_s8 = sshra.s32 %s1101_s5, 4  ;;  %s1750_s8 = int_to_ptr.hbm [resolvable:$true] %s1749_s8 }
  0x57   : > { %s1751_s19 = scalar_lea.hbm %s1750_s8, 512  ;;  %s1755_s23 = scalar_lea.hbm %s2231_s3, 1024 }
  0x58   : > { %p1752_p7 = scmp.ne.s32.totalorder %s1750_s8, %s1751_s19  ;;  %p1756_p10 = scmp.lt.s32.totalorder %s1750_s8, %s2231_s3 }
  0x59   : > { %p1757_p11 = scmp.lt.s32.totalorder %s1755_s23, %s1751_s19 }
  0x5a   : > { %p1753_p8 = pnand %p1752_p7, %p1940_p0 }
  0x5b   : > { %p1758_p12 = por %p1757_p11, %p1756_p10 }
  0x5c   : > { %p1754_p9 = pneg %p1753_p8 }
  0x5e   : > { %p1759_p13 = pnand %p1758_p12, %p1754_p9 }
  0x61   : > { %675 = vmatmul.bf16.gmra.mxu0 %v1245_v42 }
  0x62   : > { %764 = vmatmul.bf16.gmra.mxu1 %v1249_v43 }
  0x63   : > { %853 = vmatmul.bf16.gmra.mxu2 %v1245_v42  ;;  %v1309_v42 = vor.u32 %v1515_v38, %v1308_v37 }
  0x64   : > { %942 = vmatmul.bf16.gmra.mxu3 %v1249_v43 }
  0x71   : > { %680 = vmatmul.bf16.gmra.mxu0 %v1253_v48 }
  0x72   : > { %769 = vmatmul.bf16.gmra.mxu1 %v1257_v49 }
  0x73   : > { %858 = vmatmul.bf16.gmra.mxu2 %v1253_v48 }
  0x74   : > { %947 = vmatmul.bf16.gmra.mxu3 %v1257_v49 }
  0x81   : > { %685 = vmatmul.bf16.gmra.mxu0 %v1261_v54 }
  0x82   : > { %774 = vmatmul.bf16.gmra.mxu1 %v1265_v55 }
  0x83   : > { %863 = vmatmul.bf16.gmra.mxu2 %v1261_v54 }
  0x84   : > { %952 = vmatmul.bf16.gmra.mxu3 %v1265_v55 }
  0x91   : > { %690 = vmatmul.bf16.gmra.mxu0 %v1269_v60 }
  0x92   : > { %779 = vmatmul.bf16.gmra.mxu1 %v1273_v61 }
  0x93   : > { %868 = vmatmul.bf16.gmra.mxu2 %v1269_v60  ;;  %v1517_v60 = vld [vmem:[#allocation2 + $0xa4] sm:$0xf0] }
  0x94   : > { %957 = vmatmul.bf16.gmra.mxu3 %v1273_v61  ;;  %v1516_v61 = vld [vmem:[#allocation2 + $0xa4] sm:$0xf]  ;;  %v1317_v0 = vor.u32 %v1517_v60, %v1316_v59 }
  0x95   : > { %v1321_v4 = vor.u32 %v1516_v61, %v1318_v62 }
  0xa1   : > { %695 = vmatmul.bf16.gmra.mxu0 %v1277_v2 }
  0xa2   : > { %784 = vmatmul.bf16.gmra.mxu1 %v1281_v3 }
  0xa3   : > { %873 = vmatmul.bf16.gmra.mxu2 %v1277_v2 }
  0xa4   : > { %962 = vmatmul.bf16.gmra.mxu3 %v1281_v3 }
  0xb1   : > { %700 = vmatmul.bf16.gmra.mxu0 %v1285_v8 }
  0xb2   : > { %789 = vmatmul.bf16.gmra.mxu1 %v1289_v9 }
  0xb3   : > { %878 = vmatmul.bf16.gmra.mxu2 %v1285_v8 }
  0xb4   : > { %967 = vmatmul.bf16.gmra.mxu3 %v1289_v9 }
  0xc1   : > { %705 = vmatmul.bf16.gmra.mxu0 %v1293_v14 }
  0xc2   : > { %794 = vmatmul.bf16.gmra.mxu1 %v1297_v15 }
  0xc3   : > { %883 = vmatmul.bf16.gmra.mxu2 %v1293_v14 }
  0xc4   : > { %972 = vmatmul.bf16.gmra.mxu3 %v1297_v15 }
  0xce   : > { %v671_v23 = vpop.f32.mrf.mxu0 }
  0xcf   : > { %v672_v25 = vadd.f32 %v671_v23, %v2054_v19  ;;  %v760_v26 = vpop.f32.mrf.mxu1  ;;  %v1325_v23 = vor.u32 %v1519_v18, %v1324_v17 }
  0xd1   : > { %v761_v27 = vadd.f32 %v760_v26, %v672_v25  ;;  %710 = vmatmul.bf16.gmra.mxu0 %v1301_v22 }
  0xd2   : > { %799 = vmatmul.bf16.gmra.mxu1 %v1305_v24 }
  0xd3   : > { %888 = vmatmul.bf16.gmra.mxu2 %v1301_v22  ;;  %1018 = vst [vmem:[%s2060_s20] sm:$0xff] %v761_v27  ;;  %v1329_v27 = vor.u32 %v1518_v20, %v1326_v21 }
  0xd4   : > { %977 = vmatmul.bf16.gmra.mxu3 %v1305_v24 }
  0xd6   : > { %v849_v29 = vpop.f32.mrf.mxu2  ;;  %v673_v32 = vpop.f32.mrf.mxu0 }
  0xd7   : > { %v850_v30 = vadd.f32 %v849_v29, %v2058_v28  ;;  %v938_v31 = vpop.f32.mrf.mxu3  ;;  %v674_v33 = vadd.f32 %v673_v32, %v2054_v19  ;;  %v762_v34 = vpop.f32.mrf.mxu1 }
  0xd9   : > { %v939_v35 = vadd.f32 %v938_v31, %v850_v30  ;;  %v763_v36 = vadd.f32 %v762_v34, %v674_v33 }
  0xdb   : > { %1019 = vst [vmem:[%s2060_s20 + $0x8] sm:$0xff] %v939_v35 }
  0xdc   : > { %1020 = vst [vmem:[%s2060_s20 + $0x10] sm:$0xff] %v763_v36 }
  0xde   : > { %v851_v41 = vpop.f32.mrf.mxu2  ;;  %v676_v45 = vpop.f32.mrf.mxu0 }
  0xdf   : > { %v852_v43 = vadd.f32 %v851_v41, %v2058_v28  ;;  %v940_v44 = vpop.f32.mrf.mxu3  ;;  %v677_v47 = vadd.f32 %v676_v45, %v2054_v19  ;;  %v765_v48 = vpop.f32.mrf.mxu1  ;;  %v1332_v41 = vld [vmem:[#allocation2 + $0xc0] sm:$0xf] }
  0xe1   : > { %v941_v49 = vadd.f32 %v940_v44, %v852_v43  ;;  %v766_v50 = vadd.f32 %v765_v48, %v677_v47  ;;  %715 = vmatmul.bf16.gmra.mxu0 %v1309_v42  ;;  %v1520_v43 = vld [vmem:[#allocation2 + $0xc4] sm:$0xf]  ;;  %v1334_v44 = vld [vmem:[#allocation2 + $0xc8] sm:$0xf0] }
  0xe2   : > { %804 = vmatmul.bf16.gmra.mxu1 %v1313_v46 }
  0xe3   : > { %1021 = vst [vmem:[%s2060_s20 + $0x18] sm:$0xff] %v941_v49  ;;  %893 = vmatmul.bf16.gmra.mxu2 %v1309_v42  ;;  %v1521_v42 = vld [vmem:[#allocation2 + $0xc4] sm:$0xf0] }
  0xe4   : > { %1022 = vst [vmem:[%s2060_s20 + $0x20] sm:$0xff] %v766_v50  ;;  %982 = vmatmul.bf16.gmra.mxu3 %v1313_v46  ;;  %v1333_v46 = vor.u32 %v1521_v42, %v1332_v41  ;;  %v1337_v50 = vor.u32 %v1520_v43, %v1334_v44 }
  0xe6   : > { %v854_v51 = vpop.f32.mrf.mxu2  ;;  %v678_v54 = vpop.f32.mrf.mxu0 }
  0xe7   : > { %v855_v52 = vadd.f32 %v854_v51, %v2058_v28  ;;  %v943_v53 = vpop.f32.mrf.mxu3  ;;  %v679_v55 = vadd.f32 %v678_v54, %v2054_v19  ;;  %v767_v56 = vpop.f32.mrf.mxu1 }
  0xe9   : > { %v944_v57 = vadd.f32 %v943_v53, %v855_v52  ;;  %v768_v58 = vadd.f32 %v767_v56, %v679_v55 }
  0xeb   : > { %1023 = vst [vmem:[%s2060_s20 + $0x28] sm:$0xff] %v944_v57 }
  0xec   : > { %1024 = vst [vmem:[%s2060_s20 + $0x30] sm:$0xff] %v768_v58 }
  0xee   : > { %v856_v63 = vpop.f32.mrf.mxu2  ;;  %v681_v3 = vpop.f32.mrf.mxu0 }
  0xef   : > { %v857_v1 = vadd.f32 %v856_v63, %v2058_v28  ;;  %v945_v2 = vpop.f32.mrf.mxu3  ;;  %v682_v5 = vadd.f32 %v681_v3, %v2054_v19  ;;  %v770_v6 = vpop.f32.mrf.mxu1  ;;  %v1340_v63 = vld [vmem:[#allocation2 + $0xd0] sm:$0xf] }
  0xf1   : > { %v946_v7 = vadd.f32 %v945_v2, %v857_v1  ;;  %v771_v8 = vadd.f32 %v770_v6, %v682_v5  ;;  %720 = vmatmul.bf16.gmra.mxu0 %v1317_v0  ;;  %v1522_v1 = vld [vmem:[#allocation2 + $0xd4] sm:$0xf]  ;;  %v1342_v2 = vld [vmem:[#allocation2 + $0xd8] sm:$0xf0] }
  0xf2   : > { %809 = vmatmul.bf16.gmra.mxu1 %v1321_v4 }
  0xf3   : > { %1025 = vst [vmem:[%s2060_s20 + $0x38] sm:$0xff] %v946_v7  ;;  %898 = vmatmul.bf16.gmra.mxu2 %v1317_v0  ;;  %v1523_v0 = vld [vmem:[#allocation2 + $0xd4] sm:$0xf0] }
  0xf4   : > { %1026 = vst [vmem:[%s2060_s20 + $0x40] sm:$0xff] %v771_v8  ;;  %987 = vmatmul.bf16.gmra.mxu3 %v1321_v4  ;;  %v1341_v4 = vor.u32 %v1523_v0, %v1340_v63  ;;  %v1345_v8 = vor.u32 %v1522_v1, %v1342_v2 }
  0xf6   : > { %v859_v9 = vpop.f32.mrf.mxu2  ;;  %v683_v12 = vpop.f32.mrf.mxu0 }
  0xf7   : > { %v860_v10 = vadd.f32 %v859_v9, %v2058_v28  ;;  %v948_v11 = vpop.f32.mrf.mxu3  ;;  %v684_v13 = vadd.f32 %v683_v12, %v2054_v19  ;;  %v772_v14 = vpop.f32.mrf.mxu1 }
  0xf9   : > { %v949_v15 = vadd.f32 %v948_v11, %v860_v10  ;;  %v773_v16 = vadd.f32 %v772_v14, %v684_v13 }
  0xfb   : > { %1027 = vst [vmem:[%s2060_s20 + $0x48] sm:$0xff] %v949_v15 }
  0xfc   : > { %1028 = vst [vmem:[%s2060_s20 + $0x50] sm:$0xff] %v773_v16 }
  0xfe   : > { %v861_v22 = vpop.f32.mrf.mxu2  ;;  %v686_v26 = vpop.f32.mrf.mxu0 }
  0xff   : > { %v862_v24 = vadd.f32 %v861_v22, %v2058_v28  ;;  %v950_v25 = vpop.f32.mrf.mxu3  ;;  %v687_v29 = vadd.f32 %v686_v26, %v2054_v19  ;;  %v775_v30 = vpop.f32.mrf.mxu1  ;;  %v1348_v22 = vld [vmem:[#allocation2 + $0xe0] sm:$0xf] }
 0x101   : > { %v951_v31 = vadd.f32 %v950_v25, %v862_v24  ;;  %v776_v32 = vadd.f32 %v775_v30, %v687_v29  ;;  %725 = vmatmul.bf16.gmra.mxu0 %v1325_v23  ;;  %v1524_v24 = vld [vmem:[#allocation2 + $0xe4] sm:$0xf]  ;;  %v1350_v25 = vld [vmem:[#allocation2 + $0xe8] sm:$0xf0] }
 0x102   : > { %814 = vmatmul.bf16.gmra.mxu1 %v1329_v27 }
 0x103   : > { %1029 = vst [vmem:[%s2060_s20 + $0x58] sm:$0xff] %v951_v31  ;;  %903 = vmatmul.bf16.gmra.mxu2 %v1325_v23  ;;  %v1525_v23 = vld [vmem:[#allocation2 + $0xe4] sm:$0xf0] }
 0x104   : > { %1030 = vst [vmem:[%s2060_s20 + $0x60] sm:$0xff] %v776_v32  ;;  %992 = vmatmul.bf16.gmra.mxu3 %v1329_v27  ;;  %v1349_v27 = vor.u32 %v1525_v23, %v1348_v22  ;;  %v1353_v32 = vor.u32 %v1524_v24, %v1350_v25 }
 0x106   : > { %v864_v33 = vpop.f32.mrf.mxu2  ;;  %v688_v36 = vpop.f32.mrf.mxu0 }
 0x107   : > { %v865_v34 = vadd.f32 %v864_v33, %v2058_v28  ;;  %v953_v35 = vpop.f32.mrf.mxu3  ;;  %v689_v37 = vadd.f32 %v688_v36, %v2054_v19  ;;  %v777_v38 = vpop.f32.mrf.mxu1 }
 0x109   : > { %v954_v39 = vadd.f32 %v953_v35, %v865_v34  ;;  %v778_v40 = vadd.f32 %v777_v38, %v689_v37 }
 0x10b   : > { %1031 = vst [vmem:[%s2060_s20 + $0x68] sm:$0xff] %v954_v39 }
 0x10c   : > { %1032 = vst [vmem:[%s2060_s20 + $0x70] sm:$0xff] %v778_v40 }
 0x10e   : > { %v866_v45 = vpop.f32.mrf.mxu2  ;;  %v691_v49 = vpop.f32.mrf.mxu0 }
 0x10f   : > { %v867_v47 = vadd.f32 %v866_v45, %v2058_v28  ;;  %v955_v48 = vpop.f32.mrf.mxu3  ;;  %v692_v51 = vadd.f32 %v691_v49, %v2054_v19  ;;  %v780_v52 = vpop.f32.mrf.mxu1  ;;  %v1356_v45 = vld [vmem:[#allocation2 + $0xf0] sm:$0xf] }
 0x111   : > { %v956_v53 = vadd.f32 %v955_v48, %v867_v47  ;;  %v781_v54 = vadd.f32 %v780_v52, %v692_v51  ;;  %730 = vmatmul.bf16.gmra.mxu0 %v1333_v46  ;;  %v1526_v47 = vld [vmem:[#allocation2 + $0xf4] sm:$0xf]  ;;  %v1358_v48 = vld [vmem:[#allocation2 + $0xf8] sm:$0xf0] }
 0x112   : > { %819 = vmatmul.bf16.gmra.mxu1 %v1337_v50 }
 0x113   : > { %1033 = vst [vmem:[%s2060_s20 + $0x78] sm:$0xff] %v956_v53  ;;  %908 = vmatmul.bf16.gmra.mxu2 %v1333_v46  ;;  %v1527_v46 = vld [vmem:[#allocation2 + $0xf4] sm:$0xf0] }
 0x114   : > { %1034 = vst [vmem:[%s2060_s20 + $0x80] sm:$0xff] %v781_v54  ;;  %997 = vmatmul.bf16.gmra.mxu3 %v1337_v50  ;;  %v1357_v50 = vor.u32 %v1527_v46, %v1356_v45  ;;  %v1361_v54 = vor.u32 %v1526_v47, %v1358_v48 }
 0x116   : > { %v869_v55 = vpop.f32.mrf.mxu2  ;;  %v693_v58 = vpop.f32.mrf.mxu0 }
 0x117   : > { %v870_v56 = vadd.f32 %v869_v55, %v2058_v28  ;;  %v958_v57 = vpop.f32.mrf.mxu3  ;;  %v694_v59 = vadd.f32 %v693_v58, %v2054_v19  ;;  %v782_v60 = vpop.f32.mrf.mxu1 }
 0x119   : > { %v959_v61 = vadd.f32 %v958_v57, %v870_v56  ;;  %v783_v62 = vadd.f32 %v782_v60, %v694_v59 }
 0x11b   : > { %1035 = vst [vmem:[%s2060_s20 + $0x88] sm:$0xff] %v959_v61 }
 0x11c   : > { %1036 = vst [vmem:[%s2060_s20 + $0x90] sm:$0xff] %v783_v62 }
 0x11e   : > { %v871_v3 = vpop.f32.mrf.mxu2  ;;  %v696_v7 = vpop.f32.mrf.mxu0 }
 0x11f   : > { %v872_v5 = vadd.f32 %v871_v3, %v2058_v28  ;;  %v960_v6 = vpop.f32.mrf.mxu3  ;;  %v697_v9 = vadd.f32 %v696_v7, %v2054_v19  ;;  %v785_v10 = vpop.f32.mrf.mxu1 }
 0x121   : > { %v961_v11 = vadd.f32 %v960_v6, %v872_v5  ;;  %v786_v12 = vadd.f32 %v785_v10, %v697_v9  ;;  %735 = vmatmul.bf16.gmra.mxu0 %v1341_v4 }
 0x122   : > { %824 = vmatmul.bf16.gmra.mxu1 %v1345_v8 }
 0x123   : > { %1037 = vst [vmem:[%s2060_s20 + $0x98] sm:$0xff] %v961_v11  ;;  %913 = vmatmul.bf16.gmra.mxu2 %v1341_v4 }
 0x124   : > { %1038 = vst [vmem:[%s2060_s20 + $0xa0] sm:$0xff] %v786_v12  ;;  %1002 = vmatmul.bf16.gmra.mxu3 %v1345_v8 }
 0x126   : > { %v874_v13 = vpop.f32.mrf.mxu2  ;;  %v698_v16 = vpop.f32.mrf.mxu0 }
 0x127   : > { %v875_v14 = vadd.f32 %v874_v13, %v2058_v28  ;;  %v963_v15 = vpop.f32.mrf.mxu3  ;;  %v699_v17 = vadd.f32 %v698_v16, %v2054_v19  ;;  %v787_v18 = vpop.f32.mrf.mxu1 }
 0x129   : > { %v964_v20 = vadd.f32 %v963_v15, %v875_v14  ;;  %v788_v21 = vadd.f32 %v787_v18, %v699_v17 }
 0x12b   : > { %1039 = vst [vmem:[%s2060_s20 + $0xa8] sm:$0xff] %v964_v20 }
 0x12c   : > { %1040 = vst [vmem:[%s2060_s20 + $0xb0] sm:$0xff] %v788_v21 }
 0x12e   : > { %v876_v26 = vpop.f32.mrf.mxu2  ;;  %v701_v31 = vpop.f32.mrf.mxu0 }
 0x12f   : > { %v877_v29 = vadd.f32 %v876_v26, %v2058_v28  ;;  %v965_v30 = vpop.f32.mrf.mxu3  ;;  %v702_v33 = vadd.f32 %v701_v31, %v2054_v19  ;;  %v790_v34 = vpop.f32.mrf.mxu1 }
 0x131   : > { %v966_v35 = vadd.f32 %v965_v30, %v877_v29  ;;  %v791_v36 = vadd.f32 %v790_v34, %v702_v33  ;;  %740 = vmatmul.bf16.gmra.mxu0 %v1349_v27 }
 0x132   : > { %829 = vmatmul.bf16.gmra.mxu1 %v1353_v32 }
 0x133   : > { %1041 = vst [vmem:[%s2060_s20 + $0xb8] sm:$0xff] %v966_v35  ;;  %918 = vmatmul.bf16.gmra.mxu2 %v1349_v27 }
 0x134   : > { %1042 = vst [vmem:[%s2060_s20 + $0xc0] sm:$0xff] %v791_v36  ;;  %1007 = vmatmul.bf16.gmra.mxu3 %v1353_v32 }
 0x136   : > { %v879_v37 = vpop.f32.mrf.mxu2  ;;  %v703_v40 = vpop.f32.mrf.mxu0 }
 0x137   : > { %v880_v38 = vadd.f32 %v879_v37, %v2058_v28  ;;  %v968_v39 = vpop.f32.mrf.mxu3  ;;  %v704_v41 = vadd.f32 %v703_v40, %v2054_v19  ;;  %v792_v42 = vpop.f32.mrf.mxu1 }
 0x139   : > { %v969_v43 = vadd.f32 %v968_v39, %v880_v38  ;;  %v793_v44 = vadd.f32 %v792_v42, %v704_v41 }
 0x13b   : > { %1043 = vst [vmem:[%s2060_s20 + $0xc8] sm:$0xff] %v969_v43 }
 0x13c   : > { %1044 = vst [vmem:[%s2060_s20 + $0xd0] sm:$0xff] %v793_v44 }
 0x13e   : > { %v881_v49 = vpop.f32.mrf.mxu2  ;;  %v706_v53 = vpop.f32.mrf.mxu0 }
 0x13f   : > { %v882_v51 = vadd.f32 %v881_v49, %v2058_v28  ;;  %v970_v52 = vpop.f32.mrf.mxu3  ;;  %v707_v55 = vadd.f32 %v706_v53, %v2054_v19  ;;  %v795_v56 = vpop.f32.mrf.mxu1 }
 0x141   : > { %v971_v57 = vadd.f32 %v970_v52, %v882_v51  ;;  %v796_v58 = vadd.f32 %v795_v56, %v707_v55  ;;  %745 = vmatmul.bf16.gmra.mxu0 %v1357_v50 }
 0x142   : > { %834 = vmatmul.bf16.gmra.mxu1 %v1361_v54 }
 0x143   : > { %1045 = vst [vmem:[%s2060_s20 + $0xd8] sm:$0xff] %v971_v57  ;;  %923 = vmatmul.bf16.gmra.mxu2 %v1357_v50 }
 0x144   : > { %1046 = vst [vmem:[%s2060_s20 + $0xe0] sm:$0xff] %v796_v58  ;;  %1012 = vmatmul.bf16.gmra.mxu3 %v1361_v54 }
 0x146   : > { %v884_v59 = vpop.f32.mrf.mxu2  ;;  %v708_v62 = vpop.f32.mrf.mxu0 }
 0x147   : > { %v885_v60 = vadd.f32 %v884_v59, %v2058_v28  ;;  %v973_v61 = vpop.f32.mrf.mxu3  ;;  %v709_v63 = vadd.f32 %v708_v62, %v2054_v19  ;;  %v797_v0 = vpop.f32.mrf.mxu1 }
 0x149   : > { %v974_v1 = vadd.f32 %v973_v61, %v885_v60  ;;  %v798_v2 = vadd.f32 %v797_v0, %v709_v63 }
 0x14b   : > { %1047 = vst [vmem:[%s2060_s20 + $0xe8] sm:$0xff] %v974_v1 }
 0x14c   : > { %1048 = vst [vmem:[%s2060_s20 + $0xf0] sm:$0xff] %v798_v2 }
 0x14e   : > { %v886_v3 = vpop.f32.mrf.mxu2  ;;  %v711_v6 = vpop.f32.mrf.mxu0 }
 0x14f   : > { %v887_v4 = vadd.f32 %v886_v3, %v2058_v28  ;;  %v975_v5 = vpop.f32.mrf.mxu3  ;;  %v712_v7 = vadd.f32 %v711_v6, %v2054_v19  ;;  %v800_v8 = vpop.f32.mrf.mxu1 }
 0x151   : > { %v976_v9 = vadd.f32 %v975_v5, %v887_v4  ;;  %v801_v10 = vadd.f32 %v800_v8, %v712_v7 }
 0x153   : > { %1049 = vst [vmem:[%s2060_s20 + $0xf8] sm:$0xff] %v976_v9 }
 0x154   : > { %1050 = vst [vmem:[%s2060_s20 + $0x100] sm:$0xff] %v801_v10 }
 0x156   : > { %v889_v11 = vpop.f32.mrf.mxu2  ;;  %v713_v14 = vpop.f32.mrf.mxu0 }
 0x157   : > { %v890_v12 = vadd.f32 %v889_v11, %v2058_v28  ;;  %v978_v13 = vpop.f32.mrf.mxu3  ;;  %v714_v15 = vadd.f32 %v713_v14, %v2054_v19  ;;  %v802_v16 = vpop.f32.mrf.mxu1 }
 0x159   : > { %v979_v17 = vadd.f32 %v978_v13, %v890_v12  ;;  %v803_v18 = vadd.f32 %v802_v16, %v714_v15 }
 0x15b   : > { %1051 = vst [vmem:[%s2060_s20 + $0x108] sm:$0xff] %v979_v17 }
 0x15c   : > { %1052 = vst [vmem:[%s2060_s20 + $0x110] sm:$0xff] %v803_v18 }
 0x15e   : > { %v891_v20 = vpop.f32.mrf.mxu2  ;;  %v716_v23 = vpop.f32.mrf.mxu0 }
 0x15f   : > { %v892_v21 = vadd.f32 %v891_v20, %v2058_v28  ;;  %v980_v22 = vpop.f32.mrf.mxu3  ;;  %v717_v24 = vadd.f32 %v716_v23, %v2054_v19  ;;  %v805_v25 = vpop.f32.mrf.mxu1 }
 0x161   : > { %v981_v26 = vadd.f32 %v980_v22, %v892_v21  ;;  %v806_v27 = vadd.f32 %v805_v25, %v717_v24 }
 0x163   : > { %1053 = vst [vmem:[%s2060_s20 + $0x118] sm:$0xff] %v981_v26 }
 0x164   : > { %1054 = vst [vmem:[%s2060_s20 + $0x120] sm:$0xff] %v806_v27 }
 0x166   : > { %v894_v29 = vpop.f32.mrf.mxu2  ;;  %v718_v32 = vpop.f32.mrf.mxu0 }
 0x167   : > { %v895_v30 = vadd.f32 %v894_v29, %v2058_v28  ;;  %v983_v31 = vpop.f32.mrf.mxu3  ;;  %v719_v33 = vadd.f32 %v718_v32, %v2054_v19  ;;  %v807_v34 = vpop.f32.mrf.mxu1 }
 0x169   : > { %v984_v35 = vadd.f32 %v983_v31, %v895_v30  ;;  %v808_v36 = vadd.f32 %v807_v34, %v719_v33 }
 0x16b   : > { %1055 = vst [vmem:[%s2060_s20 + $0x128] sm:$0xff] %v984_v35 }
 0x16c   : > { %1056 = vst [vmem:[%s2060_s20 + $0x130] sm:$0xff] %v808_v36 }
 0x16e   : > { %v896_v37 = vpop.f32.mrf.mxu2  ;;  %v721_v40 = vpop.f32.mrf.mxu0 }
 0x16f   : > { %v897_v38 = vadd.f32 %v896_v37, %v2058_v28  ;;  %v985_v39 = vpop.f32.mrf.mxu3  ;;  %v722_v41 = vadd.f32 %v721_v40, %v2054_v19  ;;  %v810_v42 = vpop.f32.mrf.mxu1 }
 0x171   : > { %v986_v43 = vadd.f32 %v985_v39, %v897_v38  ;;  %v811_v44 = vadd.f32 %v810_v42, %v722_v41 }
 0x173   : > { %1057 = vst [vmem:[%s2060_s20 + $0x138] sm:$0xff] %v986_v43 }
 0x174   : > { %1058 = vst [vmem:[%s2060_s20 + $0x140] sm:$0xff] %v811_v44 }
 0x176   : > { %v899_v45 = vpop.f32.mrf.mxu2  ;;  %v723_v48 = vpop.f32.mrf.mxu0 }
 0x177   : > { %v900_v46 = vadd.f32 %v899_v45, %v2058_v28  ;;  %v988_v47 = vpop.f32.mrf.mxu3  ;;  %v724_v49 = vadd.f32 %v723_v48, %v2054_v19  ;;  %v812_v50 = vpop.f32.mrf.mxu1 }
 0x179   : > { %v989_v51 = vadd.f32 %v988_v47, %v900_v46  ;;  %v813_v52 = vadd.f32 %v812_v50, %v724_v49 }
 0x17b   : > { %1059 = vst [vmem:[%s2060_s20 + $0x148] sm:$0xff] %v989_v51 }
 0x17c   : > { %1060 = vst [vmem:[%s2060_s20 + $0x150] sm:$0xff] %v813_v52 }
 0x17e   : > { %v901_v53 = vpop.f32.mrf.mxu2  ;;  %v726_v56 = vpop.f32.mrf.mxu0 }
 0x17f   : > { %v902_v54 = vadd.f32 %v901_v53, %v2058_v28  ;;  %v990_v55 = vpop.f32.mrf.mxu3  ;;  %v727_v57 = vadd.f32 %v726_v56, %v2054_v19  ;;  %v815_v58 = vpop.f32.mrf.mxu1 }
 0x181   : > { %v991_v59 = vadd.f32 %v990_v55, %v902_v54  ;;  %v816_v60 = vadd.f32 %v815_v58, %v727_v57 }
 0x183   : > { %1061 = vst [vmem:[%s2060_s20 + $0x158] sm:$0xff] %v991_v59 }
 0x184   : > { %1062 = vst [vmem:[%s2060_s20 + $0x160] sm:$0xff] %v816_v60 }
 0x186   : > { %v904_v61 = vpop.f32.mrf.mxu2  ;;  %v728_v0 = vpop.f32.mrf.mxu0 }
 0x187   : > { %v905_v62 = vadd.f32 %v904_v61, %v2058_v28  ;;  %v993_v63 = vpop.f32.mrf.mxu3  ;;  %v729_v1 = vadd.f32 %v728_v0, %v2054_v19  ;;  %v817_v2 = vpop.f32.mrf.mxu1 }
 0x189   : > { %v994_v3 = vadd.f32 %v993_v63, %v905_v62  ;;  %v818_v4 = vadd.f32 %v817_v2, %v729_v1 }
 0x18b   : > { %1063 = vst [vmem:[%s2060_s20 + $0x168] sm:$0xff] %v994_v3 }
 0x18c   : > { %1064 = vst [vmem:[%s2060_s20 + $0x170] sm:$0xff] %v818_v4 }
 0x18e   : > { %v906_v5 = vpop.f32.mrf.mxu2  ;;  %v731_v8 = vpop.f32.mrf.mxu0 }
 0x18f   : > { %v907_v6 = vadd.f32 %v906_v5, %v2058_v28  ;;  %v995_v7 = vpop.f32.mrf.mxu3  ;;  %v732_v9 = vadd.f32 %v731_v8, %v2054_v19  ;;  %v820_v10 = vpop.f32.mrf.mxu1 }
 0x191   : > { %v996_v11 = vadd.f32 %v995_v7, %v907_v6  ;;  %v821_v12 = vadd.f32 %v820_v10, %v732_v9 }
 0x193   : > { %1065 = vst [vmem:[%s2060_s20 + $0x178] sm:$0xff] %v996_v11 }
 0x194   : > { %1066 = vst [vmem:[%s2060_s20 + $0x180] sm:$0xff] %v821_v12 }
 0x196   : > { %v909_v13 = vpop.f32.mrf.mxu2  ;;  %v733_v16 = vpop.f32.mrf.mxu0 }
 0x197   : > { %v910_v14 = vadd.f32 %v909_v13, %v2058_v28  ;;  %v998_v15 = vpop.f32.mrf.mxu3  ;;  %v734_v17 = vadd.f32 %v733_v16, %v2054_v19  ;;  %v822_v18 = vpop.f32.mrf.mxu1 }
 0x199   : > { %v999_v20 = vadd.f32 %v998_v15, %v910_v14  ;;  %v823_v21 = vadd.f32 %v822_v18, %v734_v17 }
 0x19b   : > { %1067 = vst [vmem:[%s2060_s20 + $0x188] sm:$0xff] %v999_v20 }
 0x19c   : > { %1068 = vst [vmem:[%s2060_s20 + $0x190] sm:$0xff] %v823_v21 }
 0x19e   : > { %v911_v22 = vpop.f32.mrf.mxu2  ;;  %v736_v25 = vpop.f32.mrf.mxu0 }
 0x19f   : > { %v912_v23 = vadd.f32 %v911_v22, %v2058_v28  ;;  %v1000_v24 = vpop.f32.mrf.mxu3  ;;  %v737_v26 = vadd.f32 %v736_v25, %v2054_v19  ;;  %v825_v27 = vpop.f32.mrf.mxu1 }
 0x1a1   : > { %v1001_v29 = vadd.f32 %v1000_v24, %v912_v23  ;;  %v826_v30 = vadd.f32 %v825_v27, %v737_v26 }
 0x1a3   : > { %1069 = vst [vmem:[%s2060_s20 + $0x198] sm:$0xff] %v1001_v29 }
 0x1a4   : > { %1070 = vst [vmem:[%s2060_s20 + $0x1a0] sm:$0xff] %v826_v30 }
 0x1a6   : > { %v914_v31 = vpop.f32.mrf.mxu2  ;;  %v738_v34 = vpop.f32.mrf.mxu0 }
 0x1a7   : > { %v915_v32 = vadd.f32 %v914_v31, %v2058_v28  ;;  %v1003_v33 = vpop.f32.mrf.mxu3  ;;  %v739_v35 = vadd.f32 %v738_v34, %v2054_v19  ;;  %v827_v36 = vpop.f32.mrf.mxu1 }
 0x1a9   : > { %v1004_v37 = vadd.f32 %v1003_v33, %v915_v32  ;;  %v828_v38 = vadd.f32 %v827_v36, %v739_v35 }
 0x1ab   : > { %1071 = vst [vmem:[%s2060_s20 + $0x1a8] sm:$0xff] %v1004_v37 }
 0x1ac   : > { %1072 = vst [vmem:[%s2060_s20 + $0x1b0] sm:$0xff] %v828_v38 }
 0x1ae   : > { %v916_v39 = vpop.f32.mrf.mxu2  ;;  %v741_v42 = vpop.f32.mrf.mxu0 }
 0x1af   : > { %v917_v40 = vadd.f32 %v916_v39, %v2058_v28  ;;  %v1005_v41 = vpop.f32.mrf.mxu3  ;;  %v742_v43 = vadd.f32 %v741_v42, %v2054_v19  ;;  %v830_v44 = vpop.f32.mrf.mxu1 }
 0x1b1   : > { %v1006_v45 = vadd.f32 %v1005_v41, %v917_v40  ;;  %v831_v46 = vadd.f32 %v830_v44, %v742_v43 }
 0x1b3   : > { %1073 = vst [vmem:[%s2060_s20 + $0x1b8] sm:$0xff] %v1006_v45 }
 0x1b4   : > { %1074 = vst [vmem:[%s2060_s20 + $0x1c0] sm:$0xff] %v831_v46 }
 0x1b6   : > { %v919_v47 = vpop.f32.mrf.mxu2  ;;  %v743_v50 = vpop.f32.mrf.mxu0 }
 0x1b7   : > { %v920_v48 = vadd.f32 %v919_v47, %v2058_v28  ;;  %v1008_v49 = vpop.f32.mrf.mxu3  ;;  %v744_v51 = vadd.f32 %v743_v50, %v2054_v19  ;;  %v832_v52 = vpop.f32.mrf.mxu1 }
 0x1b9   : > { %v1009_v53 = vadd.f32 %v1008_v49, %v920_v48  ;;  %v833_v54 = vadd.f32 %v832_v52, %v744_v51 }
 0x1bb   : > { %1075 = vst [vmem:[%s2060_s20 + $0x1c8] sm:$0xff] %v1009_v53 }
 0x1bc   : > { %1076 = vst [vmem:[%s2060_s20 + $0x1d0] sm:$0xff] %v833_v54 }
 0x1be   : > { %v921_v55 = vpop.f32.mrf.mxu2  ;;  %v746_v58 = vpop.f32.mrf.mxu0 }
 0x1bf   : > { %v922_v56 = vadd.f32 %v921_v55, %v2058_v28  ;;  %v1010_v57 = vpop.f32.mrf.mxu3  ;;  %v747_v59 = vadd.f32 %v746_v58, %v2054_v19  ;;  %v835_v60 = vpop.f32.mrf.mxu1 }
 0x1c1   : > { %v1011_v61 = vadd.f32 %v1010_v57, %v922_v56  ;;  %v836_v62 = vadd.f32 %v835_v60, %v747_v59 }
 0x1c3   : > { %1077 = vst [vmem:[%s2060_s20 + $0x1d8] sm:$0xff] %v1011_v61 }
 0x1c4   : > { %1078 = vst [vmem:[%s2060_s20 + $0x1e0] sm:$0xff] %v836_v62 }
 0x1c6   : > { %v924_v63 = vpop.f32.mrf.mxu2  ;;  %v748_v2 = vpop.f32.mrf.mxu0 }
 0x1c7   : > { %v925_v0 = vadd.f32 %v924_v63, %v2058_v28  ;;  %v1013_v1 = vpop.f32.mrf.mxu3  ;;  %v749_v3 = vadd.f32 %v748_v2, %v2054_v19  ;;  %v837_v5 = vpop.f32.mrf.mxu1 }
 0x1c9   : > { %v1014_v4 = vadd.f32 %v1013_v1, %v925_v0  ;;  %v838_v6 = vadd.f32 %v837_v5, %v749_v3 }
 0x1cb   : > { %1079 = vst [vmem:[%s2060_s20 + $0x1e8] sm:$0xff] %v1014_v4 }
 0x1cc   : > { %1080 = vst [vmem:[%s2060_s20 + $0x1f0] sm:$0xff] %v838_v6 }
 0x1ce   : > { %v926_v7 = vpop.f32.mrf.mxu2 }
 0x1cf   : > { %v927_v8 = vadd.f32 %v926_v7, %v2058_v28  ;;  %v1015_v9 = vpop.f32.mrf.mxu3 }
 0x1d1   : > { %v1016_v19 = vadd.f32 %v1015_v9, %v927_v8 }
 0x1d3   : > { %1081 = vst [vmem:[%s2060_s20 + $0x1f8] sm:$0xff] %v1016_v19 }
 0x1d4   : > { %1762 = shalt.err (!%p1759_p13)
}
 0x1d5   : > { %s1827_s9 = smov 256   ;;  %s1828_s6 = smov 512  }
 0x1d6   : > { %s1829_s7 = smov 16  }
 0x1d7   : > { %1569 = dma.vmem_to_hbm [thread:$0]  (%p1940_p0), %s1099_s4, 8192, %s1101_s5, %s1083_s15, %s1827_s9, %s1828_s6, %s1829_s7  }
 0x1d8 PF: > { %s1115_s10 = sand.u32 1, %s1801_s12   ;;  %p1583_p3 = pnand %p1223_p4, %p1944_p2 }
 0x1d9   : > { %s1116_s11 = scalar_lea.sflag [#allocation4], %s1115_s10 }
 0x1da   : > { %p1584_p5 = pneg %p1583_p3 }
 0x1dc   : > { %1796 = dma.done.wait (%p1584_p5), %s1116_s11, 8192  }
 0x1dd   : > { %1798 = vsyncadd (%p1584_p5), %s1116_s11, 4294959104  ;;  %s20_s17 = sadd.s32 1, %s1821_s17   ;;  %s2246_s12 = smov %s1805_s13 }
 0x1de   : > { %p17_p1 = scmp.ge.s32.totalorder %s20_s17, 4   ;;  %s2247_s13 = smov %s1809_s14 }
 0x1df   : > { %s2248_s14 = smov %s1901_s24  ;;  %s2249_s15 = smov %s1817_s16 }
 0x1e0   : > { %s2250_s16 = smov %s2252_s18  ;;  %19 = sbr.rel (!%p17_p1) target bundleno = 10 (0xa), region = 94 }
 0x1e5   :  { %1122 = vsyncpa [#allocation3], 1 }
 0x1e6   :  { %1124 = vsyncpa [#allocation3 + $0x1], 1 }
 0x1e7   :  { %1125 = vsyncpa [#allocation6], 1 }
 0x1e8   :  { %1127 = vsyncpa [#allocation6 + $0x1], 1 }
 0x1e9   :  { %1128 = vsyncpa [#allocation4], 1 }
 0x1ea   :  { %1130 = vsyncpa [#allocation4 + $0x1], 1 }

</bundles_post_ra>
